<compile_context>
chip_gen: v7x
topology: tpu7x:2x2x1
jax: 0.10.0
libtpu: 0.0.40
codegen_flags: <defaults>
</compile_context>

<pallas_src>
import functools

import jax
import jax.numpy as jnp
from jax.experimental import pallas as pl
from jax.experimental.pallas import tpu as pltpu


def _round_up(v, m):
    return (v + m - 1) // m * m


def ginv_lstm_kernel(s_ref, alpha_ref, wcat_ref, bias_ref, h0_ref,
                     out_ref, c_scr, pre_scr, *,
                     seq_len, chunk, hp, has_tail, unroll):
    """Grid = (batch_tiles, time_chunks); one grid step = `chunk` LSTM steps."""
    ci = pl.program_id(1)                    # time-chunk index (sequential)
    num_chunks = pl.num_programs(1)

    @pl.when(ci == 0)
    def _():
        out_ref[...] = h0_ref[...]           # h state lives in the resident output
        c_scr[...] = jnp.zeros_like(c_scr)

    # Hoisted input-dependent pre-activation: one vectorized pass per chunk,
    # entirely off the serial recurrence chain.
    pre_scr[...] = s_ref[...] * alpha_ref[...] + bias_ref[...]

    wcat = wcat_ref[...]                     # (hp, 4*hp) fused transposed weights
    # TODO(synk): at large hp, verify in the bundle dump that the wcat weight
    # push is hoisted out of the unrolled loop; if not, drive the MXU with
    # pltpu.matmul_push_rhs / matmul_acc_lhs / matmul_pop to keep it stationary.

    def make_step(masked):
        def step(j, carry):
            h, c = carry
            pre = pre_scr[j] + jnp.dot(h, wcat,
                                       preferred_element_type=jnp.float32)
            sig = jax.nn.sigmoid(pre)                    # single EUP pass over 4H
            i = sig[:, 0 * hp:1 * hp]
            f = sig[:, 1 * hp:2 * hp]
            g = 2.0 * sig[:, 2 * hp:3 * hp] - 1.0        # tanh(x) = 2*sigmoid(2x) - 1
            o = sig[:, 3 * hp:4 * hp]
            c_new = f * c + i * g
            h_new = o * jnp.tanh(c_new)
            if masked:
                # Only the (single) tail chunk ever pays for this.
                m = (ci * chunk + j < seq_len).astype(jnp.float32)
                h_new = h + m * (h_new - h)
                c_new = c + m * (c_new - c)
            return h_new, c_new
        return step

    def run(masked):
        h, c = jax.lax.fori_loop(0, chunk, make_step(masked),
                                 (out_ref[...], c_scr[...]), unroll=unroll)
        out_ref[...] = h                     # one writeback per chunk, not per step
        c_scr[...] = c

    if has_tail:
        @pl.when(ci == num_chunks - 1)
        def _():
            run(masked=True)

        @pl.when(ci != num_chunks - 1)
        def _():
            run(masked=False)
    else:
        run(masked=False)


@functools.partial(jax.jit, static_argnames=("chunk", "num_batch_tiles"))
def ginv_lstm_forward(x_nld, alpha, ibeta, w, lbias, h0,
                      chunk=128, num_batch_tiles=1):
    """x_nld: (N, L, D).  Returns (H, N), exactly like the PyTorch forward
    (which returns swapdims(hidden_state, 0, 1) of the final (N, H) state)."""
    n, seq_len, d = x_nld.shape
    hid = alpha.shape[-1]

    chunk = max(1, min(chunk, seq_len))
    num_chunks = pl.cdiv(seq_len, chunk)
    lp = num_chunks * chunk
    has_tail = lp != seq_len
    np_ = _round_up(n, 8)                       # sublane padding
    # Lane-align the per-gate width when hid is large; keep it tight when tiny.
    hp = _round_up(hid, 128) if hid >= 96 else _round_up(hid, 32)

    if num_batch_tiles > 1 and np_ % (8 * num_batch_tiles) == 0:
        n_btiles = num_batch_tiles              # set to 2 on v7x for N >= 16
    else:
        n_btiles = 1
    tile_n = np_ // n_btiles

    unroll = max(1, min(8, chunk))              # cap unroll; LLO still schedules well

    f32 = jnp.float32

    # --- invariant statistic, precomputed outside the kernel -----------------
    s = jnp.sum(x_nld.astype(f32), axis=-1)                       # (N, L)
    s = jnp.swapaxes(s, 0, 1)                                     # (L, N) time-major
    s = jnp.pad(s, ((0, lp - seq_len), (0, np_ - n)))
    s = s.reshape(lp, np_, 1)

    # --- fused, padded, gate-scaled parameters (gate order i, f, g, o) -------
    gate_scale = jnp.array([1.0, 1.0, 2.0, 1.0], f32)             # x2 on g: tanh via sigmoid

    def pad_gate(p):                                              # (4, hid) -> (4, hp)
        return jnp.pad(p.astype(f32), ((0, 0), (0, hp - hid)))

    alpha_cat = (pad_gate(alpha) * gate_scale[:, None]).reshape(1, 4 * hp)
    bias_cat = (pad_gate(ibeta + lbias) * gate_scale[:, None]).reshape(1, 4 * hp)

    wt = jnp.swapaxes(w.astype(f32), -1, -2)                      # Linear: h @ W.T
    wt = jnp.pad(wt, ((0, 0), (0, hp - hid), (0, hp - hid)))      # (4, hp, hp)
    wt = wt * gate_scale[:, None, None]
    wcat = jnp.concatenate([wt[k] for k in range(4)], axis=1)     # (hp, 4*hp)

    h0p = jnp.pad(h0.astype(f32), ((0, np_ - n), (0, hp - hid)))  # (Np, hp)

    h_final = pl.pallas_call(
        functools.partial(ginv_lstm_kernel, seq_len=seq_len, chunk=chunk,
                          hp=hp, has_tail=has_tail, unroll=unroll),
        out_shape=jax.ShapeDtypeStruct((np_, hp), f32),
        grid_spec=pltpu.PrefetchScalarGridSpec(
            num_scalar_prefetch=0,
            grid=(n_btiles, num_chunks),
            in_specs=[
                pl.BlockSpec((chunk, tile_n, 1), lambda b, c: (c, b, 0)),  # S chunk
                pl.BlockSpec((1, 4 * hp), lambda b, c: (0, 0)),            # fused alpha
                pl.BlockSpec((hp, 4 * hp), lambda b, c: (0, 0)),           # fused W.T
                pl.BlockSpec((1, 4 * hp), lambda b, c: (0, 0)),            # fused bias
                pl.BlockSpec((tile_n, hp), lambda b, c: (b, 0)),           # H0 tile
            ],
            out_specs=pl.BlockSpec((tile_n, hp), lambda b, c: (b, 0)),     # resident h
            scratch_shapes=[
                pltpu.VMEM((tile_n, hp), jnp.float32),             # cell state
                pltpu.VMEM((chunk, tile_n, 4 * hp), jnp.float32),  # hoisted pre-acts
            ],
        ),
        compiler_params=pltpu.CompilerParams(
            dimension_semantics=("parallel", "arbitrary")),
    )(s, alpha_cat, wcat, bias_cat, h0p)

    # strip padding, then match torch's `swapdims(hidden_state, 0, 1)` -> (H, N)
    return jnp.swapaxes(h_final[:n, :hid], 0, 1)


def reference_forward(x_nld, alpha, ibeta, w, lbias, h0):
    """Pure-JAX reference mirroring the PyTorch loop (in float32)."""
    x_lnd = jnp.swapaxes(x_nld, 0, 1)
    n = x_nld.shape[0]
    hid = alpha.shape[-1]
    h = h0
    c = jnp.zeros((n, hid), jnp.float32)
    for t in range(x_lnd.shape[0]):
        s = jnp.sum(x_lnd[t], axis=-1, keepdims=True)
        pre = [s * alpha[k][None, :] + ibeta[k][None, :]
               + h @ w[k].T + lbias[k][None, :] for k in range(4)]
        i = jax.nn.sigmoid(pre[0])
        f = jax.nn.sigmoid(pre[1])
        g = jnp.tanh(pre[2])
        o = jax.nn.sigmoid(pre[3])
        c = f * c + i * g
        h = o * jnp.tanh(c)
    return jnp.swapaxes(h, 0, 1)


if __name__ == "__main__":
    # Small shapes consistent with the module: X is (N, L, input_dim).
    N, L, INPUT_DIM, HIDDEN_DIM = 4, 8, 16, 32

    key = jax.random.PRNGKey(0)
    kx, ka, kb, kw, kl = jax.random.split(key, 5)

    x = jax.random.normal(kx, (N, L, INPUT_DIM), dtype=jnp.float32)

    # Stacked gate parameters, order (i, f, g, o).
    alpha = 0.1 * jax.random.normal(ka, (4, HIDDEN_DIM), dtype=jnp.float32)
    ibeta = 0.1 * jax.random.normal(kb, (4, HIDDEN_DIM), dtype=jnp.float32)
    w = 0.1 * jax.random.normal(kw, (4, HIDDEN_DIM, HIDDEN_DIM),
                                dtype=jnp.float32)
    lbias = 0.1 * jax.random.normal(kl, (4, HIDDEN_DIM), dtype=jnp.float32)
    h0 = jnp.zeros((N, HIDDEN_DIM), dtype=jnp.float32)   # H=None path

    ref = reference_forward(x, alpha, ibeta, w, lbias, h0)

    # 1) steady-state path: chunk clamps to L, divides exactly (no tail mask).
    out = jax.block_until_ready(ginv_lstm_forward(x, alpha, ibeta, w, lbias, h0))
    assert out.shape == (HIDDEN_DIM, N), out.shape
    assert jnp.allclose(out, ref, atol=1e-4, rtol=1e-4), \
        float(jnp.max(jnp.abs(out - ref)))

    # 2) tail path: chunk does not divide L -> masked last chunk only.
    out2 = jax.block_until_ready(
        ginv_lstm_forward(x, alpha, ibeta, w, lbias, h0, chunk=5))
    assert jnp.allclose(out2, ref, atol=1e-4, rtol=1e-4), \
        float(jnp.max(jnp.abs(out2 - ref)))

    # 3) batch-tiled path (v7x megacore split over rows), larger batch.
    N2 = 16
    x2 = jax.random.normal(jax.random.PRNGKey(1), (N2, L, INPUT_DIM),
                           dtype=jnp.float32)
    h02 = jnp.zeros((N2, HIDDEN_DIM), dtype=jnp.float32)
    ref2 = reference_forward(x2, alpha, ibeta, w, lbias, h02)
    out3 = jax.block_until_ready(
        ginv_lstm_forward(x2, alpha, ibeta, w, lbias, h02, num_batch_tiles=2))
    assert jnp.allclose(out3, ref2, atol=1e-4, rtol=1e-4), \
        float(jnp.max(jnp.abs(out3 - ref2)))

    print("KERNEL_OK")
</pallas_src>

<mosaic_0001>
module attributes {stable_mosaic.version = 11 : i64} {
  func.func @ginv_lstm_kernel(%arg0: i32, %arg1: i32, %arg2: memref<8x8x1xf32, #tpu.memory_space<vmem>>, %arg3: memref<1x128xf32, #tpu.memory_space<vmem>>, %arg4: memref<32x128xf32, #tpu.memory_space<vmem>>, %arg5: memref<1x128xf32, #tpu.memory_space<vmem>>, %arg6: memref<8x32xf32, #tpu.memory_space<vmem>>, %arg7: memref<8x32xf32, #tpu.memory_space<vmem>>, %arg8: memref<8x32xf32, #tpu.memory_space<vmem>>, %arg9: memref<8x8x128xf32, #tpu.memory_space<vmem>>) attributes {dimension_semantics = [#tpu.dimension_semantics<parallel>, #tpu.dimension_semantics<arbitrary>], iteration_bounds = array<i64: 1, 1>, scalar_prefetch = 0 : i64, scratch_operands = 2 : i64, tpu.core_type = #tpu.core_type<tc>, window_params = [{transform_indices = @transform_0, window_bounds = array<i64: 8, 8, 1>}, {pipeline_mode = #tpu.pipeline_mode<synchronous>, transform_indices = @transform_1, window_bounds = array<i64: 1, 128>}, {pipeline_mode = #tpu.pipeline_mode<synchronous>, transform_indices = @transform_2, window_bounds = array<i64: 32, 128>}, {pipeline_mode = #tpu.pipeline_mode<synchronous>, transform_indices = @transform_3, window_bounds = array<i64: 1, 128>}, {transform_indices = @transform_4, window_bounds = array<i64: 8, 32>}, {transform_indices = @transform_5, window_bounds = array<i64: 8, 32>}]} {
    %c0_i32 = arith.constant 0 : i32
    %0 = arith.cmpi eq, %arg1, %c0_i32 : i32
    %1 = arith.extui %0 : i1 to i32
    %c0_i32_0 = arith.constant 0 : i32
    %2 = arith.cmpi ne, %1, %c0_i32_0 : i32
    scf.if %2 {
      %c0_68 = arith.constant 0 : index
      %c0_69 = arith.constant 0 : index
      %203 = vector.load %arg6[%c0_68, %c0_69] : memref<8x32xf32, #tpu.memory_space<vmem>>, vector<8x32xf32>
      %c0_70 = arith.constant 0 : index
      %c0_71 = arith.constant 0 : index
      %204 = vector.load %arg7[%c0_70, %c0_71] : memref<8x32xf32, #tpu.memory_space<vmem>>, vector<8x32xf32>
      tpu.vector_store %arg7[%c0_70, %c0_71], %203 {strides = array<i32>} : memref<8x32xf32, #tpu.memory_space<vmem>>, vector<8x32xf32>,
      %cst_72 = arith.constant 0.000000e+00 : f32
      %205 = vector.broadcast %cst_72 : f32 to vector<8x32xf32>
      %c0_73 = arith.constant 0 : index
      %c0_74 = arith.constant 0 : index
      %206 = vector.load %arg8[%c0_73, %c0_74] : memref<8x32xf32, #tpu.memory_space<vmem>>, vector<8x32xf32>
      tpu.vector_store %arg8[%c0_73, %c0_74], %205 {strides = array<i32>} : memref<8x32xf32, #tpu.memory_space<vmem>>, vector<8x32xf32>,
    } else {
    }
    %c0 = arith.constant 0 : index
    %c0_1 = arith.constant 0 : index
    %c0_2 = arith.constant 0 : index
    %3 = vector.load %arg2[%c0, %c0_1, %c0_2] : memref<8x8x1xf32, #tpu.memory_space<vmem>>, vector<8x8x1xf32>
    %c0_3 = arith.constant 0 : index
    %c0_4 = arith.constant 0 : index
    %4 = vector.load %arg3[%c0_3, %c0_4] : memref<1x128xf32, #tpu.memory_space<vmem>>, vector<1x128xf32>
    %5 = vector.shape_cast %4 : vector<1x128xf32> to vector<1x1x128xf32>
    %6 = vector.broadcast %3 : vector<8x8x1xf32> to vector<8x8x128xf32>
    %7 = vector.broadcast %5 : vector<1x1x128xf32> to vector<8x8x128xf32>
    %8 = arith.mulf %6, %7 : vector<8x8x128xf32>
    %c0_5 = arith.constant 0 : index
    %c0_6 = arith.constant 0 : index
    %9 = vector.load %arg5[%c0_5, %c0_6] : memref<1x128xf32, #tpu.memory_space<vmem>>, vector<1x128xf32>
    %10 = vector.shape_cast %9 : vector<1x128xf32> to vector<1x1x128xf32>
    %11 = vector.broadcast %10 : vector<1x1x128xf32> to vector<8x8x128xf32>
    %12 = arith.addf %8, %11 : vector<8x8x128xf32>
    %c0_7 = arith.constant 0 : index
    %c0_8 = arith.constant 0 : index
    %c0_9 = arith.constant 0 : index
    %13 = vector.load %arg9[%c0_7, %c0_8, %c0_9] : memref<8x8x128xf32, #tpu.memory_space<vmem>>, vector<8x8x128xf32>
    tpu.vector_store %arg9[%c0_7, %c0_8, %c0_9], %12 {strides = array<i32>} : memref<8x8x128xf32, #tpu.memory_space<vmem>>, vector<8x8x128xf32>,
    %c0_10 = arith.constant 0 : index
    %c0_11 = arith.constant 0 : index
    %14 = vector.load %arg4[%c0_10, %c0_11] : memref<32x128xf32, #tpu.memory_space<vmem>>, vector<32x128xf32>
    %c0_12 = arith.constant 0 : index
    %c0_13 = arith.constant 0 : index
    %15 = vector.load %arg7[%c0_12, %c0_13] : memref<8x32xf32, #tpu.memory_space<vmem>>, vector<8x32xf32>
    %c0_14 = arith.constant 0 : index
    %c0_15 = arith.constant 0 : index
    %16 = vector.load %arg8[%c0_14, %c0_15] : memref<8x32xf32, #tpu.memory_space<vmem>>, vector<8x32xf32>
    %c0_i32_16 = arith.constant 0 : i32
    %17 = arith.index_cast %c0_i32_16 : i32 to index
    %c0_17 = arith.constant 0 : index
    %c0_18 = arith.constant 0 : index
    %18 = vector.load %arg9[%17, %c0_17, %c0_18] : memref<8x8x128xf32, #tpu.memory_space<vmem>>, vector<1x8x128xf32>
    %19 = vector.shape_cast %18 : vector<1x8x128xf32> to vector<8x128xf32>
    %cst = arith.constant dense<0.000000e+00> : vector<8x128xf32>
    %20 = tpu.matmul %15, %14, %cst {dimension_numbers = #tpu.dot_dimension_numbers<[1], [0], [0], [1], [0, 0, 1, 1], [], []>} : vector<8x32xf32>, vector<32x128xf32>, vector<8x128xf32> -> vector<8x128xf32>
    %21 = arith.addf %19, %20 : vector<8x128xf32>
    %22 = arith.negf %21 : vector<8x128xf32>
    %23 = math.exp %22 : vector<8x128xf32>
    %cst_19 = arith.constant 1.000000e+00 : f32
    %24 = vector.broadcast %cst_19 : f32 to vector<8x128xf32>
    %25 = arith.addf %24, %23 : vector<8x128xf32>
    %26 = arith.divf %24, %25 : vector<8x128xf32>
    %27 = vector.extract_strided_slice %26 {offsets = [0, 0], sizes = [8, 32], strides = [1, 1]} : vector<8x128xf32> to vector<8x32xf32>
    %28 = vector.extract_strided_slice %26 {offsets = [0, 32], sizes = [8, 32], strides = [1, 1]} : vector<8x128xf32> to vector<8x32xf32>
    %29 = vector.extract_strided_slice %26 {offsets = [0, 64], sizes = [8, 32], strides = [1, 1]} : vector<8x128xf32> to vector<8x32xf32>
    %cst_20 = arith.constant 2.000000e+00 : f32
    %30 = vector.broadcast %cst_20 : f32 to vector<8x32xf32>
    %31 = arith.mulf %30, %29 : vector<8x32xf32>
    %cst_21 = arith.constant 1.000000e+00 : f32
    %32 = vector.broadcast %cst_21 : f32 to vector<8x32xf32>
    %33 = arith.subf %31, %32 : vector<8x32xf32>
    %34 = vector.extract_strided_slice %26 {offsets = [0, 96], sizes = [8, 32], strides = [1, 1]} : vector<8x128xf32> to vector<8x32xf32>
    %35 = arith.mulf %28, %16 : vector<8x32xf32>
    %36 = arith.mulf %27, %33 : vector<8x32xf32>
    %37 = arith.addf %35, %36 : vector<8x32xf32>
    %38 = math.tanh %37 : vector<8x32xf32>
    %39 = arith.mulf %34, %38 : vector<8x32xf32>
    %c1_i32 = arith.constant 1 : i32
    %40 = arith.index_cast %c1_i32 : i32 to index
    %c0_22 = arith.constant 0 : index
    %c0_23 = arith.constant 0 : index
    %41 = vector.load %arg9[%40, %c0_22, %c0_23] : memref<8x8x128xf32, #tpu.memory_space<vmem>>, vector<1x8x128xf32>
    %42 = vector.shape_cast %41 : vector<1x8x128xf32> to vector<8x128xf32>
    %cst_24 = arith.constant dense<0.000000e+00> : vector<8x128xf32>
    %43 = tpu.matmul %39, %14, %cst_24 {dimension_numbers = #tpu.dot_dimension_numbers<[1], [0], [0], [1], [0, 0, 1, 1], [], []>} : vector<8x32xf32>, vector<32x128xf32>, vector<8x128xf32> -> vector<8x128xf32>
    %44 = arith.addf %42, %43 : vector<8x128xf32>
    %45 = arith.negf %44 : vector<8x128xf32>
    %46 = math.exp %45 : vector<8x128xf32>
    %cst_25 = arith.constant 1.000000e+00 : f32
    %47 = vector.broadcast %cst_25 : f32 to vector<8x128xf32>
    %48 = arith.addf %47, %46 : vector<8x128xf32>
    %49 = arith.divf %47, %48 : vector<8x128xf32>
    %50 = vector.extract_strided_slice %49 {offsets = [0, 0], sizes = [8, 32], strides = [1, 1]} : vector<8x128xf32> to vector<8x32xf32>
    %51 = vector.extract_strided_slice %49 {offsets = [0, 32], sizes = [8, 32], strides = [1, 1]} : vector<8x128xf32> to vector<8x32xf32>
    %52 = vector.extract_strided_slice %49 {offsets = [0, 64], sizes = [8, 32], strides = [1, 1]} : vector<8x128xf32> to vector<8x32xf32>
    %cst_26 = arith.constant 2.000000e+00 : f32
    %53 = vector.broadcast %cst_26 : f32 to vector<8x32xf32>
    %54 = arith.mulf %53, %52 : vector<8x32xf32>
    %cst_27 = arith.constant 1.000000e+00 : f32
    %55 = vector.broadcast %cst_27 : f32 to vector<8x32xf32>
    %56 = arith.subf %54, %55 : vector<8x32xf32>
    %57 = vector.extract_strided_slice %49 {offsets = [0, 96], sizes = [8, 32], strides = [1, 1]} : vector<8x128xf32> to vector<8x32xf32>
    %58 = arith.mulf %51, %37 : vector<8x32xf32>
    %59 = arith.mulf %50, %56 : vector<8x32xf32>
    %60 = arith.addf %58, %59 : vector<8x32xf32>
    %61 = math.tanh %60 : vector<8x32xf32>
    %62 = arith.mulf %57, %61 : vector<8x32xf32>
    %c2_i32 = arith.constant 2 : i32
    %63 = arith.index_cast %c2_i32 : i32 to index
    %c0_28 = arith.constant 0 : index
    %c0_29 = arith.constant 0 : index
    %64 = vector.load %arg9[%63, %c0_28, %c0_29] : memref<8x8x128xf32, #tpu.memory_space<vmem>>, vector<1x8x128xf32>
    %65 = vector.shape_cast %64 : vector<1x8x128xf32> to vector<8x128xf32>
    %cst_30 = arith.constant dense<0.000000e+00> : vector<8x128xf32>
    %66 = tpu.matmul %62, %14, %cst_30 {dimension_numbers = #tpu.dot_dimension_numbers<[1], [0], [0], [1], [0, 0, 1, 1], [], []>} : vector<8x32xf32>, vector<32x128xf32>, vector<8x128xf32> -> vector<8x128xf32>
    %67 = arith.addf %65, %66 : vector<8x128xf32>
    %68 = arith.negf %67 : vector<8x128xf32>
    %69 = math.exp %68 : vector<8x128xf32>
    %cst_31 = arith.constant 1.000000e+00 : f32
    %70 = vector.broadcast %cst_31 : f32 to vector<8x128xf32>
    %71 = arith.addf %70, %69 : vector<8x128xf32>
    %72 = arith.divf %70, %71 : vector<8x128xf32>
    %73 = vector.extract_strided_slice %72 {offsets = [0, 0], sizes = [8, 32], strides = [1, 1]} : vector<8x128xf32> to vector<8x32xf32>
    %74 = vector.extract_strided_slice %72 {offsets = [0, 32], sizes = [8, 32], strides = [1, 1]} : vector<8x128xf32> to vector<8x32xf32>
    %75 = vector.extract_strided_slice %72 {offsets = [0, 64], sizes = [8, 32], strides = [1, 1]} : vector<8x128xf32> to vector<8x32xf32>
    %cst_32 = arith.constant 2.000000e+00 : f32
    %76 = vector.broadcast %cst_32 : f32 to vector<8x32xf32>
    %77 = arith.mulf %76, %75 : vector<8x32xf32>
    %cst_33 = arith.constant 1.000000e+00 : f32
    %78 = vector.broadcast %cst_33 : f32 to vector<8x32xf32>
    %79 = arith.subf %77, %78 : vector<8x32xf32>
    %80 = vector.extract_strided_slice %72 {offsets = [0, 96], sizes = [8, 32], strides = [1, 1]} : vector<8x128xf32> to vector<8x32xf32>
    %81 = arith.mulf %74, %60 : vector<8x32xf32>
    %82 = arith.mulf %73, %79 : vector<8x32xf32>
    %83 = arith.addf %81, %82 : vector<8x32xf32>
    %84 = math.tanh %83 : vector<8x32xf32>
    %85 = arith.mulf %80, %84 : vector<8x32xf32>
    %c3_i32 = arith.constant 3 : i32
    %86 = arith.index_cast %c3_i32 : i32 to index
    %c0_34 = arith.constant 0 : index
    %c0_35 = arith.constant 0 : index
    %87 = vector.load %arg9[%86, %c0_34, %c0_35] : memref<8x8x128xf32, #tpu.memory_space<vmem>>, vector<1x8x128xf32>
    %88 = vector.shape_cast %87 : vector<1x8x128xf32> to vector<8x128xf32>
    %cst_36 = arith.constant dense<0.000000e+00> : vector<8x128xf32>
    %89 = tpu.matmul %85, %14, %cst_36 {dimension_numbers = #tpu.dot_dimension_numbers<[1], [0], [0], [1], [0, 0, 1, 1], [], []>} : vector<8x32xf32>, vector<32x128xf32>, vector<8x128xf32> -> vector<8x128xf32>
    %90 = arith.addf %88, %89 : vector<8x128xf32>
    %91 = arith.negf %90 : vector<8x128xf32>
    %92 = math.exp %91 : vector<8x128xf32>
    %cst_37 = arith.constant 1.000000e+00 : f32
    %93 = vector.broadcast %cst_37 : f32 to vector<8x128xf32>
    %94 = arith.addf %93, %92 : vector<8x128xf32>
    %95 = arith.divf %93, %94 : vector<8x128xf32>
    %96 = vector.extract_strided_slice %95 {offsets = [0, 0], sizes = [8, 32], strides = [1, 1]} : vector<8x128xf32> to vector<8x32xf32>
    %97 = vector.extract_strided_slice %95 {offsets = [0, 32], sizes = [8, 32], strides = [1, 1]} : vector<8x128xf32> to vector<8x32xf32>
    %98 = vector.extract_strided_slice %95 {offsets = [0, 64], sizes = [8, 32], strides = [1, 1]} : vector<8x128xf32> to vector<8x32xf32>
    %cst_38 = arith.constant 2.000000e+00 : f32
    %99 = vector.broadcast %cst_38 : f32 to vector<8x32xf32>
    %100 = arith.mulf %99, %98 : vector<8x32xf32>
    %cst_39 = arith.constant 1.000000e+00 : f32
    %101 = vector.broadcast %cst_39 : f32 to vector<8x32xf32>
    %102 = arith.subf %100, %101 : vector<8x32xf32>
    %103 = vector.extract_strided_slice %95 {offsets = [0, 96], sizes = [8, 32], strides = [1, 1]} : vector<8x128xf32> to vector<8x32xf32>
    %104 = arith.mulf %97, %83 : vector<8x32xf32>
    %105 = arith.mulf %96, %102 : vector<8x32xf32>
    %106 = arith.addf %104, %105 : vector<8x32xf32>
    %107 = math.tanh %106 : vector<8x32xf32>
    %108 = arith.mulf %103, %107 : vector<8x32xf32>
    %c4_i32 = arith.constant 4 : i32
    %109 = arith.index_cast %c4_i32 : i32 to index
    %c0_40 = arith.constant 0 : index
    %c0_41 = arith.constant 0 : index
    %110 = vector.load %arg9[%109, %c0_40, %c0_41] : memref<8x8x128xf32, #tpu.memory_space<vmem>>, vector<1x8x128xf32>
    %111 = vector.shape_cast %110 : vector<1x8x128xf32> to vector<8x128xf32>
    %cst_42 = arith.constant dense<0.000000e+00> : vector<8x128xf32>
    %112 = tpu.matmul %108, %14, %cst_42 {dimension_numbers = #tpu.dot_dimension_numbers<[1], [0], [0], [1], [0, 0, 1, 1], [], []>} : vector<8x32xf32>, vector<32x128xf32>, vector<8x128xf32> -> vector<8x128xf32>
    %113 = arith.addf %111, %112 : vector<8x128xf32>
    %114 = arith.negf %113 : vector<8x128xf32>
    %115 = math.exp %114 : vector<8x128xf32>
    %cst_43 = arith.constant 1.000000e+00 : f32
    %116 = vector.broadcast %cst_43 : f32 to vector<8x128xf32>
    %117 = arith.addf %116, %115 : vector<8x128xf32>
    %118 = arith.divf %116, %117 : vector<8x128xf32>
    %119 = vector.extract_strided_slice %118 {offsets = [0, 0], sizes = [8, 32], strides = [1, 1]} : vector<8x128xf32> to vector<8x32xf32>
    %120 = vector.extract_strided_slice %118 {offsets = [0, 32], sizes = [8, 32], strides = [1, 1]} : vector<8x128xf32> to vector<8x32xf32>
    %121 = vector.extract_strided_slice %118 {offsets = [0, 64], sizes = [8, 32], strides = [1, 1]} : vector<8x128xf32> to vector<8x32xf32>
    %cst_44 = arith.constant 2.000000e+00 : f32
    %122 = vector.broadcast %cst_44 : f32 to vector<8x32xf32>
    %123 = arith.mulf %122, %121 : vector<8x32xf32>
    %cst_45 = arith.constant 1.000000e+00 : f32
    %124 = vector.broadcast %cst_45 : f32 to vector<8x32xf32>
    %125 = arith.subf %123, %124 : vector<8x32xf32>
    %126 = vector.extract_strided_slice %118 {offsets = [0, 96], sizes = [8, 32], strides = [1, 1]} : vector<8x128xf32> to vector<8x32xf32>
    %127 = arith.mulf %120, %106 : vector<8x32xf32>
    %128 = arith.mulf %119, %125 : vector<8x32xf32>
    %129 = arith.addf %127, %128 : vector<8x32xf32>
    %130 = math.tanh %129 : vector<8x32xf32>
    %131 = arith.mulf %126, %130 : vector<8x32xf32>
    %c5_i32 = arith.constant 5 : i32
    %132 = arith.index_cast %c5_i32 : i32 to index
    %c0_46 = arith.constant 0 : index
    %c0_47 = arith.constant 0 : index
    %133 = vector.load %arg9[%132, %c0_46, %c0_47] : memref<8x8x128xf32, #tpu.memory_space<vmem>>, vector<1x8x128xf32>
    %134 = vector.shape_cast %133 : vector<1x8x128xf32> to vector<8x128xf32>
    %cst_48 = arith.constant dense<0.000000e+00> : vector<8x128xf32>
    %135 = tpu.matmul %131, %14, %cst_48 {dimension_numbers = #tpu.dot_dimension_numbers<[1], [0], [0], [1], [0, 0, 1, 1], [], []>} : vector<8x32xf32>, vector<32x128xf32>, vector<8x128xf32> -> vector<8x128xf32>
    %136 = arith.addf %134, %135 : vector<8x128xf32>
    %137 = arith.negf %136 : vector<8x128xf32>
    %138 = math.exp %137 : vector<8x128xf32>
    %cst_49 = arith.constant 1.000000e+00 : f32
    %139 = vector.broadcast %cst_49 : f32 to vector<8x128xf32>
    %140 = arith.addf %139, %138 : vector<8x128xf32>
    %141 = arith.divf %139, %140 : vector<8x128xf32>
    %142 = vector.extract_strided_slice %141 {offsets = [0, 0], sizes = [8, 32], strides = [1, 1]} : vector<8x128xf32> to vector<8x32xf32>
    %143 = vector.extract_strided_slice %141 {offsets = [0, 32], sizes = [8, 32], strides = [1, 1]} : vector<8x128xf32> to vector<8x32xf32>
    %144 = vector.extract_strided_slice %141 {offsets = [0, 64], sizes = [8, 32], strides = [1, 1]} : vector<8x128xf32> to vector<8x32xf32>
    %cst_50 = arith.constant 2.000000e+00 : f32
    %145 = vector.broadcast %cst_50 : f32 to vector<8x32xf32>
    %146 = arith.mulf %145, %144 : vector<8x32xf32>
    %cst_51 = arith.constant 1.000000e+00 : f32
    %147 = vector.broadcast %cst_51 : f32 to vector<8x32xf32>
    %148 = arith.subf %146, %147 : vector<8x32xf32>
    %149 = vector.extract_strided_slice %141 {offsets = [0, 96], sizes = [8, 32], strides = [1, 1]} : vector<8x128xf32> to vector<8x32xf32>
    %150 = arith.mulf %143, %129 : vector<8x32xf32>
    %151 = arith.mulf %142, %148 : vector<8x32xf32>
    %152 = arith.addf %150, %151 : vector<8x32xf32>
    %153 = math.tanh %152 : vector<8x32xf32>
    %154 = arith.mulf %149, %153 : vector<8x32xf32>
    %c6_i32 = arith.constant 6 : i32
    %155 = arith.index_cast %c6_i32 : i32 to index
    %c0_52 = arith.constant 0 : index
    %c0_53 = arith.constant 0 : index
    %156 = vector.load %arg9[%155, %c0_52, %c0_53] : memref<8x8x128xf32, #tpu.memory_space<vmem>>, vector<1x8x128xf32>
    %157 = vector.shape_cast %156 : vector<1x8x128xf32> to vector<8x128xf32>
    %cst_54 = arith.constant dense<0.000000e+00> : vector<8x128xf32>
    %158 = tpu.matmul %154, %14, %cst_54 {dimension_numbers = #tpu.dot_dimension_numbers<[1], [0], [0], [1], [0, 0, 1, 1], [], []>} : vector<8x32xf32>, vector<32x128xf32>, vector<8x128xf32> -> vector<8x128xf32>
    %159 = arith.addf %157, %158 : vector<8x128xf32>
    %160 = arith.negf %159 : vector<8x128xf32>
    %161 = math.exp %160 : vector<8x128xf32>
    %cst_55 = arith.constant 1.000000e+00 : f32
    %162 = vector.broadcast %cst_55 : f32 to vector<8x128xf32>
    %163 = arith.addf %162, %161 : vector<8x128xf32>
    %164 = arith.divf %162, %163 : vector<8x128xf32>
    %165 = vector.extract_strided_slice %164 {offsets = [0, 0], sizes = [8, 32], strides = [1, 1]} : vector<8x128xf32> to vector<8x32xf32>
    %166 = vector.extract_strided_slice %164 {offsets = [0, 32], sizes = [8, 32], strides = [1, 1]} : vector<8x128xf32> to vector<8x32xf32>
    %167 = vector.extract_strided_slice %164 {offsets = [0, 64], sizes = [8, 32], strides = [1, 1]} : vector<8x128xf32> to vector<8x32xf32>
    %cst_56 = arith.constant 2.000000e+00 : f32
    %168 = vector.broadcast %cst_56 : f32 to vector<8x32xf32>
    %169 = arith.mulf %168, %167 : vector<8x32xf32>
    %cst_57 = arith.constant 1.000000e+00 : f32
    %170 = vector.broadcast %cst_57 : f32 to vector<8x32xf32>
    %171 = arith.subf %169, %170 : vector<8x32xf32>
    %172 = vector.extract_strided_slice %164 {offsets = [0, 96], sizes = [8, 32], strides = [1, 1]} : vector<8x128xf32> to vector<8x32xf32>
    %173 = arith.mulf %166, %152 : vector<8x32xf32>
    %174 = arith.mulf %165, %171 : vector<8x32xf32>
    %175 = arith.addf %173, %174 : vector<8x32xf32>
    %176 = math.tanh %175 : vector<8x32xf32>
    %177 = arith.mulf %172, %176 : vector<8x32xf32>
    %c7_i32 = arith.constant 7 : i32
    %178 = arith.index_cast %c7_i32 : i32 to index
    %c0_58 = arith.constant 0 : index
    %c0_59 = arith.constant 0 : index
    %179 = vector.load %arg9[%178, %c0_58, %c0_59] : memref<8x8x128xf32, #tpu.memory_space<vmem>>, vector<1x8x128xf32>
    %180 = vector.shape_cast %179 : vector<1x8x128xf32> to vector<8x128xf32>
    %cst_60 = arith.constant dense<0.000000e+00> : vector<8x128xf32>
    %181 = tpu.matmul %177, %14, %cst_60 {dimension_numbers = #tpu.dot_dimension_numbers<[1], [0], [0], [1], [0, 0, 1, 1], [], []>} : vector<8x32xf32>, vector<32x128xf32>, vector<8x128xf32> -> vector<8x128xf32>
    %182 = arith.addf %180, %181 : vector<8x128xf32>
    %183 = arith.negf %182 : vector<8x128xf32>
    %184 = math.exp %183 : vector<8x128xf32>
    %cst_61 = arith.constant 1.000000e+00 : f32
    %185 = vector.broadcast %cst_61 : f32 to vector<8x128xf32>
    %186 = arith.addf %185, %184 : vector<8x128xf32>
    %187 = arith.divf %185, %186 : vector<8x128xf32>
    %188 = vector.extract_strided_slice %187 {offsets = [0, 0], sizes = [8, 32], strides = [1, 1]} : vector<8x128xf32> to vector<8x32xf32>
    %189 = vector.extract_strided_slice %187 {offsets = [0, 32], sizes = [8, 32], strides = [1, 1]} : vector<8x128xf32> to vector<8x32xf32>
    %190 = vector.extract_strided_slice %187 {offsets = [0, 64], sizes = [8, 32], strides = [1, 1]} : vector<8x128xf32> to vector<8x32xf32>
    %cst_62 = arith.constant 2.000000e+00 : f32
    %191 = vector.broadcast %cst_62 : f32 to vector<8x32xf32>
    %192 = arith.mulf %191, %190 : vector<8x32xf32>
    %cst_63 = arith.constant 1.000000e+00 : f32
    %193 = vector.broadcast %cst_63 : f32 to vector<8x32xf32>
    %194 = arith.subf %192, %193 : vector<8x32xf32>
    %195 = vector.extract_strided_slice %187 {offsets = [0, 96], sizes = [8, 32], strides = [1, 1]} : vector<8x128xf32> to vector<8x32xf32>
    %196 = arith.mulf %189, %175 : vector<8x32xf32>
    %197 = arith.mulf %188, %194 : vector<8x32xf32>
    %198 = arith.addf %196, %197 : vector<8x32xf32>
    %199 = math.tanh %198 : vector<8x32xf32>
    %200 = arith.mulf %195, %199 : vector<8x32xf32>
    %c8_i32 = arith.constant 8 : i32
    %c0_64 = arith.constant 0 : index
    %c0_65 = arith.constant 0 : index
    %201 = vector.load %arg7[%c0_64, %c0_65] : memref<8x32xf32, #tpu.memory_space<vmem>>, vector<8x32xf32>
    tpu.vector_store %arg7[%c0_64, %c0_65], %200 {strides = array<i32>} : memref<8x32xf32, #tpu.memory_space<vmem>>, vector<8x32xf32>,
    %c0_66 = arith.constant 0 : index
    %c0_67 = arith.constant 0 : index
    %202 = vector.load %arg8[%c0_66, %c0_67] : memref<8x32xf32, #tpu.memory_space<vmem>>, vector<8x32xf32>
    tpu.vector_store %arg8[%c0_66, %c0_67], %198 {strides = array<i32>} : memref<8x32xf32, #tpu.memory_space<vmem>>, vector<8x32xf32>,
    return
  }
  func.func @transform_0(%arg0: i32, %arg1: i32) -> (i32, i32, i32) {
    %c0_i32 = arith.constant 0 : i32
    %c0_i32_0 = arith.constant 0 : i32
    return %arg1, %arg0, %c0_i32 : i32, i32, i32
  }
  func.func @transform_1(%arg0: i32, %arg1: i32) -> (i32, i32) {
    %c0_i32 = arith.constant 0 : i32
    %c0_i32_0 = arith.constant 0 : i32
    %c0_i32_1 = arith.constant 0 : i32
    return %c0_i32, %c0_i32_0 : i32, i32
  }
  func.func @transform_2(%arg0: i32, %arg1: i32) -> (i32, i32) {
    %c0_i32 = arith.constant 0 : i32
    %c0_i32_0 = arith.constant 0 : i32
    %c0_i32_1 = arith.constant 0 : i32
    return %c0_i32, %c0_i32_0 : i32, i32
  }
  func.func @transform_3(%arg0: i32, %arg1: i32) -> (i32, i32) {
    %c0_i32 = arith.constant 0 : i32
    %c0_i32_0 = arith.constant 0 : i32
    %c0_i32_1 = arith.constant 0 : i32
    return %c0_i32, %c0_i32_0 : i32, i32
  }
  func.func @transform_4(%arg0: i32, %arg1: i32) -> (i32, i32) {
    %c0_i32 = arith.constant 0 : i32
    %c0_i32_0 = arith.constant 0 : i32
    return %arg0, %c0_i32 : i32, i32
  }
  func.func @transform_5(%arg0: i32, %arg1: i32) -> (i32, i32) {
    %c0_i32 = arith.constant 0 : i32
    %c0_i32_0 = arith.constant 0 : i32
    return %arg0, %c0_i32 : i32, i32
  }
}

</mosaic_0001>

<bundles_post_ra>
// kernel: ginv_lstm_forward.1
= control target key start
LH: loop header
LB: loop body
LE: loop exit
PB: predicated region body
PF: predicated region fallthrough
CT: control target
= control target key end

     0   :  { %vm25_vm0 = vcmask 261120   ;;  %v1219_v0 = vmov 0.0|0.0   ;;  %vm1220_vm1 = vmmov 0   ;;  %v1221_v4 = vmov 0.0   ;;  %s1428_s2 = inlined_call_operand.vmem [shape: f32[32,128], index: 2, kind: input, shape index: {}]   ;;  %s1429_s4 = inlined_call_operand.vmem [shape: f32[8,32], index: 4, kind: input, shape index: {}]   ;;  %s1430_s5 = inlined_call_operand.vmem [shape: f32[8,32], index: 5, kind: output, shape index: {}]   ;;  %s1431_s0 = inlined_call_operand.vmem [shape: f32[8,8,1], index: 0, kind: input, shape index: {}]   ;;  %s1432_s1 = inlined_call_operand.vmem [shape: f32[1,128], index: 1, kind: input, shape index: {}]   ;;  %s1433_s3 = inlined_call_operand.vmem [shape: f32[1,128], index: 3, kind: input, shape index: {}]  }
   0x1   :  { %1114 = vmatprep.subr.bf16.mxu0 %v1219_v0  ;;  %v114_v1 = vld [vmem:[%s1428_s2] sm:$0xff]  ;;  %v115_v2 = vld [vmem:[%s1428_s2 + $0x8] sm:$0xff]  ;;  %v116_v3 = vld [vmem:[%s1428_s2 + $0x10] sm:$0xff]  ;;  %1034 = vmatprep.mubr.msk.f32.mxu0 %vm1220_vm1, %v1221_v4  ;;  %27 = vst.msk [vmem:[#allocation2] sm:$0xff] %vm25_vm0, %v1221_v4  ;;  %v1222_v8 = vmov 0  }
   0x2   :  { %v1270_v5 = vpack.c.bf16 %v115_v2, %v114_v1  ;;  %v117_v6 = vld [vmem:[%s1428_s2 + $0x18] sm:$0xff]  ;;  %v24_v7 = vld [vmem:[%s1429_s4] sm:$0xff]  ;;  %1169 = vset.pattern.permute.xlu0 %v1222_v8  ;;  %1120 = vmatprep.subr.bf16.mxu1 %v1219_v0  ;;  %s1223_s2 = smov 32   ;;  %v29_v34 = vld [vmem:[%s1431_s0 + $0x8] sm:$0xff] }
   0x3   :  { %v28_v9 = vld [vmem:[%s1431_s0] sm:$0xff]  ;;  %26 = vst.msk [vmem:[%s1430_s5] sm:$0xff] %vm25_vm0, %v24_v7  ;;  %1045 = vmatprep.mubr.msk.f32.mxu1 %vm1220_vm1, %v1221_v4  ;;  %v1289_v10 = vpack.c.bf16 %v117_v6, %v116_v3  ;;  %1170 = vset.pattern.permute.xlu1 %v1222_v8  ;;  %v30_v56 = vld [vmem:[%s1431_s0 + $0x10] sm:$0xff] }
   0x4   :  { %39 = vperm.xlu0 %1169, %v28_v9   ;;  %1116 = vmatpush3.bf16.msra.mxu0 %v1270_v5  ;;  %v1312_v13 = vld [vmem:[%s1432_s1] ss:$0 sm:$0xff]  ;;  %s1224_s1 = smov 64  }
   0x5   :  { %1122 = vmatpush3.bf16.msra.mxu1 %v1270_v5  ;;  %1117 = vmatprep.subr.bf16.mxu0 %v1219_v0  ;;  %v1318_v16 = vld [vmem:[%s1433_s3] ss:$0 sm:$0xff] }
   0x6   :  { %1123 = vmatprep.subr.bf16.mxu1 %v1219_v0 }
   0x8   :  { %1119 = vmatpush3.bf16.msra.mxu0 %v1289_v10  ;;  %v119_v11 = vld [vmem:[#allocation2] sm:$0xff] }
   0x9   :  { %1125 = vmatpush3.bf16.msra.mxu1 %v1289_v10  ;;  %205 = vrot.lane.b32.xlu1 %v119_v11, %s1223_s2 }
   0xa   :  { %1126 = vmatprep.subr.bf16.mxu0 %v1219_v0  ;;  %v118_v12 = vld [vmem:[%s1430_s5] sm:$0xff]  ;;  %1132 = vmatprep.subr.bf16.mxu1 %v1219_v0 }
   0xb   :  { %1035 = vmatmul.mubr.msk.f32.vlgmr.msra.gmra.mrb[0].mxu0 %vm25_vm0, %v118_v12 }
   0xc   :  { %1128 = vmatpush3.bf16.msra.mxu0 %v1270_v5  ;;  %1056 = vmatprep.mubr.msk.f32.mxu0 %vm1220_vm1, %v1221_v4 }
   0xd   :  { %1129 = vmatprep.subr.bf16.mxu0 %v1219_v0 }
  0x10   :  { %1131 = vmatpush3.bf16.msra.mxu0 %v1289_v10 }
  0x11   :  { %1138 = vmatprep.subr.bf16.mxu0 %v1219_v0 }
  0x7b   :  { %v206_v29 = vpop.permute.xlu1 %205 }
  0x83   :  { %v40_v14 = vpop.permute.xlu0 %39 }
  0x84   :  { %v83_v15 = vmul.f32 %v1312_v13, %v40_v14 }
  0x86   :  { %v98_v17 = vadd.f32 %v1318_v16, %v83_v15 }
  0xde   :  { %v191_v18 = vpop.f32.mrb[0].mxu0 }
  0xdf   :  { %v195_v19 = vadd.f32 %v191_v18, %v98_v17  ;;  %v1036_v20 = vpop.f32.mrb[1].mxu0 }
  0xe0   :  { %v31_v20 = vld [vmem:[%s1431_s0 + $0x18] sm:$0xff] }
  0xe1   :  { %v963_v21 = vmul.f32 -1.442695, %v195_v19 }
  0xe3   :  { %1171 = vpow2.f32 %v963_v21 }
  0xed   :  { %v1172_v22 = vpop.eup %1171 }
  0xee   :  { %v199_v23 = vadd.f32 1.0, %v1172_v22 }
  0xf0   :  { %1173 = vrcp.f32 %v199_v23 }
  0xfa   :  { %v1174_v24 = vpop.eup %1173 }
  0xfb   :  { %v202_v25 = vmul.f32 2.0, %v1174_v24  ;;  %v208_v30 = vmul.f32 %v1174_v24, %v206_v29 }
  0xfd   :  { %v964_v26 = vadd.f32 -1.0, %v202_v25 }
  0xff   :  { %210 = vrot.lane.b32.xlu0 %v964_v26, %s1224_s1 }
 0x171   :  { %v211_v27 = vpop.permute.xlu0 %210 }
 0x172   :  { %v213_v28 = vmul.f32 %v1174_v24, %v211_v27 }
 0x174   :  { %215 = vrot.lane.b32.xlu1 %v213_v28, %s1223_s2 }
 0x1e6   :  { %v216_v31 = vpop.permute.xlu1 %215 }
 0x1e7   :  { %v218_v32 = vadd.f32 %v216_v31, %v208_v30 }
 0x1e9   :  { %1175 = vtanh.f32 %v218_v32 }
 0x1f3   :  { %v1176_v33 = vpop.eup %1175 }
 0x1f4   :  { %221 = vrot.lane.b32.xlu0 %v1176_v33, %s1224_s1 }
 0x1f8   :  { %44 = vperm.xlu0 %1169, %v29_v34  }
 0x266   :  { %v222_v35 = vpop.permute.xlu0 %221 }
 0x267   :  { %v224_v36 = vmul.f32 %v1174_v24, %v222_v35 }
 0x269   :  { %228 = vrot.lane.b32.xlu1 %v224_v36, %s1223_s2 }
 0x277   :  { %v45_v38 = vpop.permute.xlu0 %44 }
 0x278   :  { %v84_v39 = vmul.f32 %v1312_v13, %v45_v38 }
 0x27a   :  { %v99_v40 = vadd.f32 %v1318_v16, %v84_v39 }
 0x2db   :  { %v229_v37 = vpop.permute.xlu1 %228 }
 0x2dc   :  { %1046 = vmatmul.mubr.msk.f32.vlgmr.msra.gmra.mrb[0].mxu1 %vm25_vm0, %v229_v37 }
 0x2dd   :  { %1134 = vmatpush3.bf16.msra.mxu1 %v1270_v5  ;;  %1067 = vmatprep.mubr.msk.f32.mxu1 %vm1220_vm1, %v1221_v4 }
 0x2de   :  { %1135 = vmatprep.subr.bf16.mxu1 %v1219_v0 }
 0x2e1   :  { %1137 = vmatpush3.bf16.msra.mxu1 %v1289_v10 }
 0x2e2   :  { %1144 = vmatprep.subr.bf16.mxu1 %v1219_v0 }
 0x3af   :  { %v298_v41 = vpop.f32.mrb[0].mxu1 }
 0x3b0   :  { %v302_v42 = vadd.f32 %v298_v41, %v99_v40  ;;  %v1047_v43 = vpop.f32.mrb[1].mxu1 }
 0x3b2   :  { %v966_v44 = vmul.f32 -1.442695, %v302_v42  ;;  %v32_v42 = vld [vmem:[%s1431_s0 + $0x20] sm:$0xff] }
 0x3b4   :  { %1177 = vpow2.f32 %v966_v44 }
 0x3be   :  { %v1178_v45 = vpop.eup %1177 }
 0x3bf   :  { %v306_v46 = vadd.f32 1.0, %v1178_v45 }
 0x3c1   :  { %1179 = vrcp.f32 %v306_v46 }
 0x3cb   :  { %v1180_v47 = vpop.eup %1179 }
 0x3cc   :  { %v309_v48 = vmul.f32 2.0, %v1180_v47  ;;  %v311_v52 = vmul.f32 %v1180_v47, %v218_v32 }
 0x3ce   :  { %v967_v49 = vadd.f32 -1.0, %v309_v48 }
 0x3d0   :  { %313 = vrot.lane.b32.xlu1 %v967_v49, %s1224_s1 }
 0x442   :  { %v314_v50 = vpop.permute.xlu1 %313 }
 0x443   :  { %v316_v51 = vmul.f32 %v1180_v47, %v314_v50 }
 0x445   :  { %318 = vrot.lane.b32.xlu0 %v316_v51, %s1223_s2 }
 0x4b7   :  { %v319_v53 = vpop.permute.xlu0 %318 }
 0x4b8   :  { %v321_v54 = vadd.f32 %v319_v53, %v311_v52 }
 0x4ba   :  { %1181 = vtanh.f32 %v321_v54 }
 0x4c4   :  { %v1182_v55 = vpop.eup %1181 }
 0x4c5   :  { %324 = vrot.lane.b32.xlu1 %v1182_v55, %s1224_s1 }
 0x4c9   :  { %49 = vperm.xlu1 %1170, %v30_v56  }
 0x537   :  { %v325_v57 = vpop.permute.xlu1 %324 }
 0x538   :  { %v327_v58 = vmul.f32 %v1180_v47, %v325_v57 }
 0x53a   :  { %331 = vrot.lane.b32.xlu0 %v327_v58, %s1223_s2 }
 0x548   :  { %v50_v60 = vpop.permute.xlu1 %49 }
 0x549   :  { %v85_v61 = vmul.f32 %v1312_v13, %v50_v60 }
 0x54b   :  { %v100_v62 = vadd.f32 %v1318_v16, %v85_v61 }
 0x5ac   :  { %v332_v59 = vpop.permute.xlu0 %331 }
 0x5ad   :  { %1057 = vmatmul.mubr.msk.f32.vlgmr.msra.gmra.mrb[2].mxu0 %vm25_vm0, %v332_v59 }
 0x5ae   :  { %1140 = vmatpush3.bf16.msra.mxu0 %v1270_v5  ;;  %1078 = vmatprep.mubr.msk.f32.mxu0 %vm1220_vm1, %v1221_v4 }
 0x5af   :  { %1141 = vmatprep.subr.bf16.mxu0 %v1219_v0 }
 0x5b2   :  { %1143 = vmatpush3.bf16.msra.mxu0 %v1289_v10 }
 0x5b3   :  { %1150 = vmatprep.subr.bf16.mxu0 %v1219_v0 }
 0x680   :  { %v401_v63 = vpop.f32.mrb[2].mxu0 }
 0x681   :  { %v405_v1 = vadd.f32 %v401_v63, %v100_v62  ;;  %v1058_v2 = vpop.f32.mrb[3].mxu0 }
 0x683   :  { %v969_v3 = vmul.f32 -1.442695, %v405_v1  ;;  %v33_v1 = vld [vmem:[%s1431_s0 + $0x28] sm:$0xff] }
 0x685   :  { %1183 = vpow2.f32 %v969_v3 }
 0x68f   :  { %v1184_v6 = vpop.eup %1183 }
 0x690   :  { %v409_v7 = vadd.f32 1.0, %v1184_v6 }
 0x692   :  { %1185 = vrcp.f32 %v409_v7 }
 0x69c   :  { %v1186_v8 = vpop.eup %1185 }
 0x69d   :  { %v412_v9 = vmul.f32 2.0, %v1186_v8  ;;  %v414_v15 = vmul.f32 %v1186_v8, %v321_v54 }
 0x69f   :  { %v970_v11 = vadd.f32 -1.0, %v412_v9 }
 0x6a1   :  { %416 = vrot.lane.b32.xlu0 %v970_v11, %s1224_s1 }
 0x713   :  { %v417_v12 = vpop.permute.xlu0 %416 }
 0x714   :  { %v419_v14 = vmul.f32 %v1186_v8, %v417_v12 }
 0x716   :  { %421 = vrot.lane.b32.xlu1 %v419_v14, %s1223_s2 }
 0x788   :  { %v422_v17 = vpop.permute.xlu1 %421 }
 0x789   :  { %v424_v18 = vadd.f32 %v422_v17, %v414_v15 }
 0x78b   :  { %1187 = vtanh.f32 %v424_v18 }
 0x795   :  { %v1188_v19 = vpop.eup %1187 }
 0x796   :  { %427 = vrot.lane.b32.xlu0 %v1188_v19, %s1224_s1 }
 0x79a   :  { %54 = vperm.xlu0 %1169, %v31_v20  }
 0x808   :  { %v428_v21 = vpop.permute.xlu0 %427 }
 0x809   :  { %v430_v22 = vmul.f32 %v1186_v8, %v428_v21 }
 0x80b   :  { %434 = vrot.lane.b32.xlu1 %v430_v22, %s1223_s2 }
 0x819   :  { %v55_v24 = vpop.permute.xlu0 %54 }
 0x81a   :  { %v86_v25 = vmul.f32 %v1312_v13, %v55_v24  ;;  %v34_v24 = vld [vmem:[%s1431_s0 + $0x30] sm:$0xff] }
 0x81c   :  { %v101_v26 = vadd.f32 %v1318_v16, %v86_v25 }
 0x87d   :  { %v435_v23 = vpop.permute.xlu1 %434 }
 0x87e   :  { %1068 = vmatmul.mubr.msk.f32.vlgmr.msra.gmra.mrb[2].mxu1 %vm25_vm0, %v435_v23 }
 0x87f   :  { %1146 = vmatpush3.bf16.msra.mxu1 %v1270_v5  ;;  %1089 = vmatprep.mubr.msk.f32.mxu1 %vm1220_vm1, %v1221_v4 }
 0x880   :  { %1147 = vmatprep.subr.bf16.mxu1 %v1219_v0 }
 0x883   :  { %1149 = vmatpush3.bf16.msra.mxu1 %v1289_v10 }
 0x884   :  { %1156 = vmatprep.subr.bf16.mxu1 %v1219_v0 }
 0x951   :  { %v504_v27 = vpop.f32.mrb[2].mxu1 }
 0x952   :  { %v508_v28 = vadd.f32 %v504_v27, %v101_v26  ;;  %v1069_v29 = vpop.f32.mrb[3].mxu1 }
 0x954   :  { %v972_v30 = vmul.f32 -1.442695, %v508_v28 }
 0x956   :  { %1189 = vpow2.f32 %v972_v30 }
 0x960   :  { %v1190_v31 = vpop.eup %1189 }
 0x961   :  { %v512_v32 = vadd.f32 1.0, %v1190_v31 }
 0x963   :  { %1191 = vrcp.f32 %v512_v32 }
 0x96d   :  { %v1192_v33 = vpop.eup %1191 }
 0x96e   :  { %v515_v34 = vmul.f32 2.0, %v1192_v33  ;;  %v517_v38 = vmul.f32 %v1192_v33, %v424_v18 }
 0x970   :  { %v973_v35 = vadd.f32 -1.0, %v515_v34 }
 0x972   :  { %519 = vrot.lane.b32.xlu1 %v973_v35, %s1224_s1 }
 0x9e4   :  { %v520_v36 = vpop.permute.xlu1 %519 }
 0x9e5   :  { %v522_v37 = vmul.f32 %v1192_v33, %v520_v36 }
 0x9e7   :  { %524 = vrot.lane.b32.xlu0 %v522_v37, %s1223_s2 }
 0xa59   :  { %v525_v39 = vpop.permute.xlu0 %524 }
 0xa5a   :  { %v527_v40 = vadd.f32 %v525_v39, %v517_v38 }
 0xa5c   :  { %1193 = vtanh.f32 %v527_v40 }
 0xa66   :  { %v1194_v41 = vpop.eup %1193 }
 0xa67   :  { %530 = vrot.lane.b32.xlu1 %v1194_v41, %s1224_s1 }
 0xa6b   :  { %59 = vperm.xlu1 %1170, %v32_v42  }
 0xad9   :  { %v531_v43 = vpop.permute.xlu1 %530 }
 0xada   :  { %v533_v44 = vmul.f32 %v1192_v33, %v531_v43 }
 0xadc   :  { %537 = vrot.lane.b32.xlu0 %v533_v44, %s1223_s2 }
 0xaea   :  { %v60_v46 = vpop.permute.xlu1 %59 }
 0xaeb   :  { %v87_v47 = vmul.f32 %v1312_v13, %v60_v46  ;;  %v35_v46 = vld [vmem:[%s1431_s0 + $0x38] sm:$0xff]  ;;  %s1225_s0 = smov 96  }
 0xaed   :  { %v102_v48 = vadd.f32 %v1318_v16, %v87_v47 }
 0xb4e   :  { %v538_v45 = vpop.permute.xlu0 %537 }
 0xb4f   :  { %1079 = vmatmul.mubr.msk.f32.vlgmr.msra.gmra.mrb[4].mxu0 %vm25_vm0, %v538_v45 }
 0xb50   :  { %1152 = vmatpush3.bf16.msra.mxu0 %v1270_v5  ;;  %1100 = vmatprep.mubr.msk.f32.mxu0 %vm1220_vm1, %v1221_v4 }
 0xb51   :  { %1153 = vmatprep.subr.bf16.mxu0 %v1219_v0 }
 0xb54   :  { %1155 = vmatpush3.bf16.msra.mxu0 %v1289_v10 }
 0xc22   :  { %v607_v49 = vpop.f32.mrb[4].mxu0 }
 0xc23   :  { %v611_v50 = vadd.f32 %v607_v49, %v102_v48  ;;  %v1080_v51 = vpop.f32.mrb[5].mxu0 }
 0xc25   :  { %v975_v52 = vmul.f32 -1.442695, %v611_v50 }
 0xc27   :  { %1195 = vpow2.f32 %v975_v52 }
 0xc31   :  { %v1196_v53 = vpop.eup %1195 }
 0xc32   :  { %v615_v54 = vadd.f32 1.0, %v1196_v53 }
 0xc34   :  { %1197 = vrcp.f32 %v615_v54 }
 0xc3e   :  { %v1198_v55 = vpop.eup %1197 }
 0xc3f   :  { %v618_v56 = vmul.f32 2.0, %v1198_v55  ;;  %v620_v60 = vmul.f32 %v1198_v55, %v527_v40 }
 0xc41   :  { %v976_v57 = vadd.f32 -1.0, %v618_v56 }
 0xc43   :  { %622 = vrot.lane.b32.xlu0 %v976_v57, %s1224_s1 }
 0xcb5   :  { %v623_v58 = vpop.permute.xlu0 %622 }
 0xcb6   :  { %v625_v59 = vmul.f32 %v1198_v55, %v623_v58 }
 0xcb8   :  { %627 = vrot.lane.b32.xlu1 %v625_v59, %s1223_s2 }
 0xd2a   :  { %v628_v61 = vpop.permute.xlu1 %627 }
 0xd2b   :  { %v630_v62 = vadd.f32 %v628_v61, %v620_v60 }
 0xd2d   :  { %1199 = vtanh.f32 %v630_v62 }
 0xd37   :  { %v1200_v63 = vpop.eup %1199 }
 0xd38   :  { %633 = vrot.lane.b32.xlu0 %v1200_v63, %s1224_s1 }
 0xd3c   :  { %64 = vperm.xlu0 %1169, %v33_v1  }
 0xdaa   :  { %v634_v2 = vpop.permute.xlu0 %633 }
 0xdab   :  { %v636_v3 = vmul.f32 %v1198_v55, %v634_v2 }
 0xdad   :  { %640 = vrot.lane.b32.xlu1 %v636_v3, %s1223_s2 }
 0xdbb   :  { %v65_v7 = vpop.permute.xlu0 %64 }
 0xdbc   :  { %v88_v8 = vmul.f32 %v1312_v13, %v65_v7 }
 0xdbe   :  { %v103_v9 = vadd.f32 %v1318_v16, %v88_v8 }
 0xe1f   :  { %v641_v6 = vpop.permute.xlu1 %640 }
 0xe20   :  { %1090 = vmatmul.mubr.msk.f32.vlgmr.msra.gmra.mrb[4].mxu1 %vm25_vm0, %v641_v6 }
 0xe21   :  { %1158 = vmatpush3.bf16.msra.mxu1 %v1270_v5  ;;  %1111 = vmatprep.mubr.msk.f32.mxu1 %vm1220_vm1, %v1221_v4 }
 0xe22   :  { %1159 = vmatprep.subr.bf16.mxu1 %v1219_v0 }
 0xe25   :  { %1161 = vmatpush3.bf16.msra.mxu1 %v1289_v10 }
 0xef3   :  { %v710_v11 = vpop.f32.mrb[4].mxu1 }
 0xef4   :  { %v714_v12 = vadd.f32 %v710_v11, %v103_v9  ;;  %v1091_v14 = vpop.f32.mrb[5].mxu1 }
 0xef6   :  { %v978_v15 = vmul.f32 -1.442695, %v714_v12 }
 0xef8   :  { %1201 = vpow2.f32 %v978_v15 }
 0xf02   :  { %v1202_v17 = vpop.eup %1201 }
 0xf03   :  { %v718_v18 = vadd.f32 1.0, %v1202_v17 }
 0xf05   :  { %1203 = vrcp.f32 %v718_v18 }
 0xf0f   :  { %v1204_v5 = vpop.eup %1203 }
 0xf10   :  { %v721_v19 = vmul.f32 2.0, %v1204_v5  ;;  %v723_v20 = vmul.f32 %v1204_v5, %v630_v62 }
 0xf12   :  { %v979_v4 = vadd.f32 -1.0, %v721_v19 }
 0xf14   :  { %725 = vrot.lane.b32.xlu1 %v979_v4, %s1224_s1 }
 0xf86   :  { %v726_v0 = vpop.permute.xlu1 %725 }
 0xf87   :  { %v728_v10 = vmul.f32 %v1204_v5, %v726_v0 }
 0xf89   :  { %730 = vrot.lane.b32.xlu0 %v728_v10, %s1223_s2 }
 0xffb   :  { %v731_v21 = vpop.permute.xlu0 %730 }
 0xffc   :  { %v733_v22 = vadd.f32 %v731_v21, %v723_v20 }
 0xffe   :  { %1205 = vtanh.f32 %v733_v22 }
0x1008   :  { %v1206_v23 = vpop.eup %1205 }
0x1009   :  { %736 = vrot.lane.b32.xlu1 %v1206_v23, %s1224_s1 }
0x100d   :  { %69 = vperm.xlu1 %1170, %v34_v24  }
0x107b   :  { %v737_v25 = vpop.permute.xlu1 %736 }
0x107c   :  { %v739_v26 = vmul.f32 %v1204_v5, %v737_v25 }
0x107e   :  { %743 = vrot.lane.b32.xlu0 %v739_v26, %s1223_s2 }
0x108c   :  { %v70_v28 = vpop.permute.xlu1 %69 }
0x108d   :  { %v89_v29 = vmul.f32 %v1312_v13, %v70_v28 }
0x108f   :  { %v104_v30 = vadd.f32 %v1318_v16, %v89_v29 }
0x10f0   :  { %v744_v27 = vpop.permute.xlu0 %743 }
0x10f1   :  { %1101 = vmatmul.mubr.msk.f32.vlgmr.msra.gmra.mrb[6].mxu0 %vm25_vm0, %v744_v27 }
0x11c4   :  { %v813_v31 = vpop.f32.mrb[6].mxu0 }
0x11c5   :  { %v817_v32 = vadd.f32 %v813_v31, %v104_v30  ;;  %v1102_v33 = vpop.f32.mrb[7].mxu0 }
0x11c7   :  { %v981_v34 = vmul.f32 -1.442695, %v817_v32 }
0x11c9   :  { %1207 = vpow2.f32 %v981_v34 }
0x11d3   :  { %v1208_v35 = vpop.eup %1207 }
0x11d4   :  { %v821_v36 = vadd.f32 1.0, %v1208_v35 }
0x11d6   :  { %1209 = vrcp.f32 %v821_v36 }
0x11e0   :  { %v1210_v37 = vpop.eup %1209 }
0x11e1   :  { %v824_v38 = vmul.f32 2.0, %v1210_v37  ;;  %v826_v42 = vmul.f32 %v1210_v37, %v733_v22 }
0x11e3   :  { %v982_v39 = vadd.f32 -1.0, %v824_v38 }
0x11e5   :  { %828 = vrot.lane.b32.xlu0 %v982_v39, %s1224_s1 }
0x1257   :  { %v829_v40 = vpop.permute.xlu0 %828 }
0x1258   :  { %v831_v41 = vmul.f32 %v1210_v37, %v829_v40 }
0x125a   :  { %833 = vrot.lane.b32.xlu1 %v831_v41, %s1223_s2 }
0x12cc   :  { %v834_v43 = vpop.permute.xlu1 %833 }
0x12cd   :  { %v836_v44 = vadd.f32 %v834_v43, %v826_v42 }
0x12cf   :  { %1211 = vtanh.f32 %v836_v44 }
0x12d9   :  { %v1212_v45 = vpop.eup %1211 }
0x12da   :  { %839 = vrot.lane.b32.xlu0 %v1212_v45, %s1224_s1 }
0x12de   :  { %74 = vperm.xlu0 %1169, %v35_v46  }
0x134c   :  { %v840_v47 = vpop.permute.xlu0 %839 }
0x134d   :  { %v842_v48 = vmul.f32 %v1210_v37, %v840_v47 }
0x134f   :  { %846 = vrot.lane.b32.xlu1 %v842_v48, %s1223_s2 }
0x135d   :  { %v75_v50 = vpop.permute.xlu0 %74 }
0x135e   :  { %v90_v51 = vmul.f32 %v1312_v13, %v75_v50 }
0x1360   :  { %v105_v52 = vadd.f32 %v1318_v16, %v90_v51 }
0x13c1   :  { %v847_v49 = vpop.permute.xlu1 %846 }
0x13c2   :  { %1112 = vmatmul.mubr.msk.f32.vlgmr.msra.gmra.mrb[6].mxu1 %vm25_vm0, %v847_v49 }
0x1495   :  { %v916_v53 = vpop.f32.mrb[6].mxu1 }
0x1496   :  { %v920_v54 = vadd.f32 %v916_v53, %v105_v52  ;;  %v1113_v55 = vpop.f32.mrb[7].mxu1 }
0x1498   :  { %v984_v56 = vmul.f32 -1.442695, %v920_v54 }
0x149a   :  { %1213 = vpow2.f32 %v984_v56 }
0x14a4   :  { %v1214_v57 = vpop.eup %1213 }
0x14a5   :  { %v924_v58 = vadd.f32 1.0, %v1214_v57 }
0x14a7   :  { %1215 = vrcp.f32 %v924_v58 }
0x14b1   :  { %v1216_v59 = vpop.eup %1215 }
0x14b2   :  { %v927_v60 = vmul.f32 2.0, %v1216_v59  ;;  %v929_v13 = vmul.f32 %v1216_v59, %v836_v44 }
0x14b4   :  { %v985_v61 = vadd.f32 -1.0, %v927_v60 }
0x14b6   :  { %931 = vrot.lane.b32.xlu1 %v985_v61, %s1224_s1 }
0x1528   :  { %v932_v62 = vpop.permute.xlu1 %931 }
0x1529   :  { %v934_v63 = vmul.f32 %v1216_v59, %v932_v62 }
0x152b   :  { %936 = vrot.lane.b32.xlu0 %v934_v63, %s1223_s2 }
0x159d   :  { %v937_v1 = vpop.permute.xlu0 %936 }
0x159e   :  { %v939_v16 = vadd.f32 %v937_v1, %v929_v13 }
0x15a0   :  { %1217 = vtanh.f32 %v939_v16 }
0x15aa   :  { %v1218_v2 = vpop.eup %1217 }
0x15ab   :  { %942 = vrot.lane.b32.xlu1 %v1218_v2, %s1224_s1 }
0x15af   :  { %952 = vrot.lane.b32.xlu1 %v939_v16, %s1225_s0 }
0x161d   :  { %v943_v3 = vpop.permute.xlu1 %942 }
0x161e   :  { %v945_v6 = vmul.f32 %v1216_v59, %v943_v3 }
0x1620   :  { %947 = vrot.lane.b32.xlu0 %v945_v6, %s1223_s2 }
0x1621   :  { %v953_v7 = vpop.permute.xlu1 %952 }
0x1622   :  { %955 = vst.msk [vmem:[#allocation2] sm:$0xff] %vm25_vm0, %v953_v7 }
0x1692   :  { %v948_v8 = vpop.permute.xlu0 %947 }
0x1693   :  { %950 = vst.msk [vmem:[%s1430_s5] sm:$0xff] %vm25_vm0, %v948_v8 }

</bundles_post_ra>
